<compile_context>
chip_gen: v6e
topology: v6e:2x2x1
jax: 0.10.0
libtpu: 0.0.40
codegen_flags: <defaults>
</compile_context>

<pallas_src>
import jax
import jax.numpy as jnp
from jax.experimental import pallas as pl
from jax.experimental.pallas import tpu as pltpu

_LANES = 128        # vreg lane width: pad class dim to a multiple of this
_SUBLANES = 8       # vreg sublane width: pad batch tiles to a multiple of this
_NEG_BIG = -1.0e30  # "minus infinity" bias for padded class columns


def _classifier_kernel(x_ref, wt_ref, b_ref, logits_ref, softmax_ref):
    # Linear layer: logits = x @ W^T + b   (MXU matmul, f32 accumulation).
    logits = jnp.dot(x_ref[...], wt_ref[...],
                     preferred_element_type=jnp.float32) + b_ref[...]
    logits_ref[...] = logits.astype(logits_ref.dtype)

    # Numerically-stable softmax over the lane-dense (padded) class axis.
    # Padded class columns carry a -1e30 bias, so exp underflows to exactly 0
    # and they never pollute the row max or the denominator.
    m = jnp.max(logits, axis=-1, keepdims=True)
    e = jnp.exp(logits - m)
    denom = jnp.sum(e, axis=-1, keepdims=True)
    # approx=True -> EUP vrcp (otherwise-idle slot); validated vs 1e-4 below.
    softmax_ref[...] = (e * pl.reciprocal(denom, approx=True)).astype(
        softmax_ref.dtype)


def _round_up(n, m):
    return ((n + m - 1) // m) * m


def prepare_classifier_params(weight, bias):
    """One-time param prep (hoisted out of the hot path).

    weight: (C, D) f32 (PyTorch Linear layout), bias: (C,) f32.
    Returns (w_t_pad: (D, Cpad), b_row_pad: (1, Cpad)) with Cpad = round_up(C, 128).
    Padded bias columns are -1e30 so the in-kernel softmax ignores them.
    """
    C, D = weight.shape
    c_pad = _round_up(C, _LANES)
    w_t_pad = jnp.zeros((D, c_pad), jnp.float32).at[:, :C].set(
        jnp.transpose(weight).astype(jnp.float32))
    b_row_pad = jnp.full((1, c_pad), _NEG_BIG, jnp.float32).at[0, :C].set(
        bias.astype(jnp.float32))
    return w_t_pad, b_row_pad


def feature_classifier(x, w_t_pad, b_row_pad, class_num):
    """x: (B, D) f32. Returns (logits, softmax), both (B, class_num) f32."""
    B, D = x.shape
    c_pad = w_t_pad.shape[1]

    # Batch tiling: lane-dense (TM, Cpad) output tiles, TM a multiple of 8.
    # Grid over batch gives BlockSpec auto-pipelining work to overlap, keeps
    # the small (D, Cpad) weight resident in VMEM, and the "parallel" axis lets
    # Mosaic shard steps across v7x's two TensorCores.
    tm = 256 if B >= 256 else _round_up(B, _SUBLANES)
    b_pad = _round_up(B, tm)
    if b_pad != B:
        x = jnp.zeros((b_pad, D), x.dtype).at[:B, :].set(x)
    grid = (b_pad // tm,)

    out_shapes = (
        jax.ShapeDtypeStruct((b_pad, c_pad), jnp.float32),
        jax.ShapeDtypeStruct((b_pad, c_pad), jnp.float32),
    )

    cost = pl.CostEstimate(
        flops=2 * b_pad * D * c_pad,
        transcendentals=b_pad * c_pad,  # exp
        bytes_accessed=4 * (b_pad * D + D * c_pad + c_pad + 2 * b_pad * c_pad),
    )

    logits_pad, softmax_pad = pl.pallas_call(
        _classifier_kernel,
        out_shape=out_shapes,
        grid_spec=pltpu.PrefetchScalarGridSpec(
            num_scalar_prefetch=0,
            grid=grid,
            in_specs=[
                pl.BlockSpec((tm, D), lambda i: (i, 0)),     # batch tile of x
                pl.BlockSpec((D, c_pad), lambda i: (0, 0)),  # resident weight
                pl.BlockSpec((1, c_pad), lambda i: (0, 0)),  # resident bias
            ],
            out_specs=[
                pl.BlockSpec((tm, c_pad), lambda i: (i, 0)),
                pl.BlockSpec((tm, c_pad), lambda i: (i, 0)),
            ],
        ),
        compiler_params=pltpu.CompilerParams(
            dimension_semantics=("parallel",)),
        cost_estimate=cost,
    )(x, w_t_pad, b_row_pad)

    # Slice the batch / lane padding back off.
    return logits_pad[:B, :class_num], softmax_pad[:B, :class_num]


if __name__ == "__main__":
    # Small shapes consistent with the module defaults: feature_dim=256, class_num=31.
    batch, feature_dim, class_num = 8, 256, 31

    key = jax.random.PRNGKey(0)
    k_x, k_w = jax.random.split(key)

    x = jax.random.normal(k_x, (batch, feature_dim), dtype=jnp.float32)
    # Deterministic parameter init matching __init__:
    #   weight ~ N(0, 0.01), bias = 0.0
    weight = 0.01 * jax.random.normal(k_w, (class_num, feature_dim),
                                      dtype=jnp.float32)
    bias = jnp.zeros((class_num,), dtype=jnp.float32)

    # One-time parameter prep (transpose + lane padding) outside the hot path.
    w_t_pad, b_row_pad = prepare_classifier_params(weight, bias)

    logits, softmax_out = feature_classifier(x, w_t_pad, b_row_pad, class_num)
    jax.block_until_ready((logits, softmax_out))

    # Sanity check against plain-JAX reference.
    ref_logits = x @ weight.T + bias
    ref_soft = jax.nn.softmax(ref_logits, axis=-1)
    assert jnp.allclose(logits, ref_logits, atol=1e-5, rtol=1e-5)
    # Softmax path uses the EUP approximate reciprocal -> slightly looser tol.
    assert jnp.allclose(softmax_out, ref_soft, atol=1e-4, rtol=1e-4)

    print("KERNEL_OK")
</pallas_src>

<mosaic_0001>
module attributes {stable_mosaic.version = 11 : i64} {
  func.func @_classifier_kernel(%arg0: i32, %arg1: memref<8x256xf32, #tpu.memory_space<vmem>>, %arg2: memref<256x128xf32, #tpu.memory_space<vmem>>, %arg3: memref<1x128xf32, #tpu.memory_space<vmem>>, %arg4: memref<8x128xf32, #tpu.memory_space<vmem>>, %arg5: memref<8x128xf32, #tpu.memory_space<vmem>>) attributes {dimension_semantics = [#tpu.dimension_semantics<parallel>], iteration_bounds = array<i64: 1>, scalar_prefetch = 0 : i64, scratch_operands = 0 : i64, tpu.core_type = #tpu.core_type<tc>, window_params = [{transform_indices = @transform_0, window_bounds = array<i64: 8, 256>}, {pipeline_mode = #tpu.pipeline_mode<synchronous>, transform_indices = @transform_1, window_bounds = array<i64: 256, 128>}, {pipeline_mode = #tpu.pipeline_mode<synchronous>, transform_indices = @transform_2, window_bounds = array<i64: 1, 128>}, {transform_indices = @transform_3, window_bounds = array<i64: 8, 128>}, {transform_indices = @transform_4, window_bounds = array<i64: 8, 128>}]} {
    %c0 = arith.constant 0 : index
    %c0_0 = arith.constant 0 : index
    %0 = vector.load %arg1[%c0, %c0_0] : memref<8x256xf32, #tpu.memory_space<vmem>>, vector<8x256xf32>
    %c0_1 = arith.constant 0 : index
    %c0_2 = arith.constant 0 : index
    %1 = vector.load %arg2[%c0_1, %c0_2] : memref<256x128xf32, #tpu.memory_space<vmem>>, vector<256x128xf32>
    %cst = arith.constant dense<0.000000e+00> : vector<8x128xf32>
    %2 = tpu.matmul %0, %1, %cst {dimension_numbers = #tpu.dot_dimension_numbers<[1], [0], [0], [1], [0, 0, 1, 1], [], []>} : vector<8x256xf32>, vector<256x128xf32>, vector<8x128xf32> -> vector<8x128xf32>
    %c0_3 = arith.constant 0 : index
    %c0_4 = arith.constant 0 : index
    %3 = vector.load %arg3[%c0_3, %c0_4] : memref<1x128xf32, #tpu.memory_space<vmem>>, vector<1x128xf32>
    %4 = vector.broadcast %3 : vector<1x128xf32> to vector<8x128xf32>
    %5 = arith.addf %2, %4 : vector<8x128xf32>
    %c0_5 = arith.constant 0 : index
    %c0_6 = arith.constant 0 : index
    %6 = vector.load %arg4[%c0_5, %c0_6] : memref<8x128xf32, #tpu.memory_space<vmem>>, vector<8x128xf32>
    tpu.vector_store %arg4[%c0_5, %c0_6], %5 {strides = array<i32>} : memref<8x128xf32, #tpu.memory_space<vmem>>, vector<8x128xf32>,
    %cst_7 = arith.constant dense<0xFF800000> : vector<8xf32>
    %7 = vector.multi_reduction <maximumf>, %5, %cst_7 [1] : vector<8x128xf32> to vector<8xf32>
    %8 = vector.shape_cast %7 : vector<8xf32> to vector<8x1xf32>
    %9 = vector.broadcast %8 : vector<8x1xf32> to vector<8x128xf32>
    %10 = arith.subf %5, %9 : vector<8x128xf32>
    %11 = math.exp %10 : vector<8x128xf32>
    %cst_8 = arith.constant dense<0.000000e+00> : vector<8xf32>
    %12 = vector.multi_reduction <add>, %11, %cst_8 [1] : vector<8x128xf32> to vector<8xf32>
    %13 = vector.shape_cast %12 : vector<8xf32> to vector<8x1xf32>
    %14 = tpu.reciprocal %13 {approx = true} : vector<8x1xf32> -> vector<8x1xf32>
    %15 = vector.broadcast %14 : vector<8x1xf32> to vector<8x128xf32>
    %16 = arith.mulf %11, %15 : vector<8x128xf32>
    %c0_9 = arith.constant 0 : index
    %c0_10 = arith.constant 0 : index
    %17 = vector.load %arg5[%c0_9, %c0_10] : memref<8x128xf32, #tpu.memory_space<vmem>>, vector<8x128xf32>
    tpu.vector_store %arg5[%c0_9, %c0_10], %16 {strides = array<i32>} : memref<8x128xf32, #tpu.memory_space<vmem>>, vector<8x128xf32>,
    return
  }
  func.func @transform_0(%arg0: i32) -> (i32, i32) {
    %c0_i32 = arith.constant 0 : i32
    %c0_i32_0 = arith.constant 0 : i32
    return %arg0, %c0_i32 : i32, i32
  }
  func.func @transform_1(%arg0: i32) -> (i32, i32) {
    %c0_i32 = arith.constant 0 : i32
    %c0_i32_0 = arith.constant 0 : i32
    %c0_i32_1 = arith.constant 0 : i32
    return %c0_i32, %c0_i32_0 : i32, i32
  }
  func.func @transform_2(%arg0: i32) -> (i32, i32) {
    %c0_i32 = arith.constant 0 : i32
    %c0_i32_0 = arith.constant 0 : i32
    %c0_i32_1 = arith.constant 0 : i32
    return %c0_i32, %c0_i32_0 : i32, i32
  }
  func.func @transform_3(%arg0: i32) -> (i32, i32) {
    %c0_i32 = arith.constant 0 : i32
    %c0_i32_0 = arith.constant 0 : i32
    return %arg0, %c0_i32 : i32, i32
  }
  func.func @transform_4(%arg0: i32) -> (i32, i32) {
    %c0_i32 = arith.constant 0 : i32
    %c0_i32_0 = arith.constant 0 : i32
    return %arg0, %c0_i32 : i32, i32
  }
}

</mosaic_0001>

<bundles_post_ra>
// kernel: tpu_custom_call.1
= control target key start
LH: loop header
LB: loop body
LE: loop exit
PB: predicated region body
PF: predicated region fallthrough
CT: control target
= control target key end

     0   :  { %10 = vsyncpa [#allocation3], 0  ;;  %s376_s0 = inlined_call_operand.hbm [shape: f32[8,256], index: 0, kind: input, shape index: {}]   ;;  %s377_s1 = inlined_call_operand.hbm [shape: f32[256,128], index: 1, kind: input, shape index: {}]   ;;  %s378_s2 = inlined_call_operand.vmem [shape: f32[1,128], index: 2, kind: input, shape index: {}]   ;;  %s379_s3 = inlined_call_operand.hbm [shape: f32[8,128], index: 3, kind: output, shape index: {0}]   ;;  %s380_s4 = inlined_call_operand.hbm [shape: f32[8,128], index: 4, kind: output, shape index: {1}]  }
   0x1   :  { %11 = vsyncpa [#allocation6], 0 }
   0x2   :  { %12 = vsyncpa [#allocation4], 0 }
   0x3   :  { %13 = vsyncpa [#allocation9], 0  ;;  %s330_s15 = smov [#allocation2]   ;;  %s331_s17 = smov [#allocation5]  }
   0x4   :  { %s20_s16 = sshll.u32 %s330_s15, 4  ;;  %s29_s18 = sshll.u32 %s331_s17, 4  ;;  %s21_s16 = int_to_ptr.vmem [resolvable:$true] %s20_s16  ;;  %s30_s18 = int_to_ptr.vmem [resolvable:$true] %s29_s18 }
   0x5   :  { %s250_s19 = scalar_lea.vmem %s21_s16, 256  ;;  %p255_p1 = scmp.lt.s32.totalorder %s21_s16, %s21_s16 }
   0x6   :  { %p251_p0 = scmp.ne.s32.totalorder %s21_s16, %s250_s19  ;;  %p256_p2 = scmp.lt.s32.totalorder %s250_s19, %s250_s19 }
   0x8   :  { %p257_p3 = por %p256_p2, %p255_p1 }
   0xa   :  { %p258_p4 = pnand %p257_p3, %p251_p0 }
   0xc   :  { %261 = shalt.err (!%p258_p4)
}
   0xd   :  { %23 = dma.hbm_to_vmem [thread:$0]  %s376_s0, 256, %s21_s16, [#allocation3]  }
   0xe   :  { %s270_s22 = scalar_lea.vmem %s30_s18, 4096  ;;  %p275_p6 = scmp.lt.s32.totalorder %s30_s18, %s30_s18 }
   0xf   :  { %p271_p5 = scmp.ne.s32.totalorder %s30_s18, %s270_s22  ;;  %p276_p7 = scmp.lt.s32.totalorder %s270_s22, %s270_s22 }
  0x11   :  { %p277_p8 = por %p276_p7, %p275_p6 }
  0x13   :  { %p278_p9 = pnand %p277_p8, %p271_p5 }
  0x15   :  { %281 = shalt.err (!%p278_p9)
}
  0x16   :  { %s332_s23 = smov 128   ;;  %s333_s24 = smov 8  }
  0x17   :  { %35 = dma.hbm_to_vmem [thread:$0]  %s377_s1, 4096, %s30_s18, [#allocation6], %s332_s23, %s332_s23, %s333_s24  }
  0x18   :  { %322 = dma.done.wait [#allocation3], 256  }
  0x19   :  { %323 = vsyncadd [#allocation3], 4294967040 }
  0x1a   :  { %324 = dma.done.wait [#allocation6], 4096  }
  0x1b   :  { %325 = vsyncadd [#allocation6], 4294963200  ;;  %v77_v0 = vld [vmem:[#allocation5 + $0xf8] sm:$0xff]  ;;  %v76_v2 = vld [vmem:[#allocation5 + $0xf0] sm:$0xff]  ;;  %s334_s27 = smov [#allocation7]  }
  0x1c   :  { %v61_v1 = vld [vmem:[#allocation5 + $0x78] sm:$0xff]  ;;  %197 = vmatprep.subr.mxu0 %v77_v0  ;;  %v60_v3 = vld [vmem:[#allocation5 + $0x70] sm:$0xff]  ;;  %v75_v4 = vld [vmem:[#allocation5 + $0xe8] sm:$0xff]  ;;  %s172_s28 = sshll.u32 %s334_s27, 4  ;;  %s173_s28 = int_to_ptr.vmem [resolvable:$true] %s172_s28 }
  0x1d   :  { %198 = vmatpush3.msra.mxu0 %v61_v1  ;;  %v59_v5 = vld [vmem:[#allocation5 + $0x68] sm:$0xff]  ;;  %v74_v6 = vld [vmem:[#allocation5 + $0xe0] sm:$0xff]  ;;  %v73_v8 = vld [vmem:[#allocation5 + $0xd8] sm:$0xff]  ;;  %s282_s29 = scalar_lea.vmem %s173_s28, 128  ;;  %p287_p11 = scmp.lt.s32.totalorder %s173_s28, %s173_s28 }
  0x1e   :  { %199 = vmatprep.subr.mxu0 %v76_v2  ;;  %v58_v7 = vld [vmem:[#allocation5 + $0x60] sm:$0xff]  ;;  %v57_v9 = vld [vmem:[#allocation5 + $0x58] sm:$0xff]  ;;  %v72_v10 = vld [vmem:[#allocation5 + $0xd0] sm:$0xff]  ;;  %p283_p10 = scmp.ne.s32.totalorder %s173_s28, %s282_s29  ;;  %p288_p12 = scmp.lt.s32.totalorder %s282_s29, %s282_s29 }
  0x1f   :  { %200 = vmatpush3.msra.mxu0 %v60_v3  ;;  %v56_v11 = vld [vmem:[#allocation5 + $0x50] sm:$0xff]  ;;  %v71_v12 = vld [vmem:[#allocation5 + $0xc8] sm:$0xff]  ;;  %v45_v13 = vld [vmem:[#allocation2 + $0x8] sm:$0xff] }
  0x20   :  { %201 = vmatprep.subr.mxu0 %v75_v4  ;;  %v55_v14 = vld [vmem:[#allocation5 + $0x48] sm:$0xff]  ;;  %149 = vmatprep.mubr.f32.mxu0 %v45_v13  ;;  %v70_v15 = vld [vmem:[#allocation5 + $0xc0] sm:$0xff]  ;;  %v69_v17 = vld [vmem:[#allocation5 + $0xb8] sm:$0xff]  ;;  %p289_p13 = por %p288_p12, %p287_p11 }
  0x21   :  { %202 = vmatpush3.msra.mxu0 %v59_v5  ;;  %v54_v16 = vld [vmem:[#allocation5 + $0x40] sm:$0xff]  ;;  %v53_v18 = vld [vmem:[#allocation5 + $0x38] sm:$0xff]  ;;  %v68_v19 = vld [vmem:[#allocation5 + $0xb0] sm:$0xff] }
  0x22   :  { %203 = vmatprep.subr.mxu0 %v74_v6  ;;  %v52_v20 = vld [vmem:[#allocation5 + $0x30] sm:$0xff]  ;;  %v67_v21 = vld [vmem:[#allocation5 + $0xa8] sm:$0xff]  ;;  %v66_v23 = vld [vmem:[#allocation5 + $0xa0] sm:$0xff]  ;;  %p290_p0 = pnand %p289_p13, %p283_p10 }
  0x23   :  { %204 = vmatpush3.msra.mxu0 %v58_v7  ;;  %v51_v22 = vld [vmem:[#allocation5 + $0x28] sm:$0xff]  ;;  %v50_v24 = vld [vmem:[#allocation5 + $0x20] sm:$0xff]  ;;  %v65_v25 = vld [vmem:[#allocation5 + $0x98] sm:$0xff] }
  0x24   :  { %205 = vmatprep.subr.mxu0 %v73_v8  ;;  %v49_v26 = vld [vmem:[#allocation5 + $0x18] sm:$0xff]  ;;  %v64_v27 = vld [vmem:[#allocation5 + $0x90] sm:$0xff]  ;;  %v63_v29 = vld [vmem:[#allocation5 + $0x88] sm:$0xff] }
  0x25   :  { %206 = vmatpush3.msra.mxu0 %v57_v9  ;;  %v48_v28 = vld [vmem:[#allocation5 + $0x10] sm:$0xff]  ;;  %v47_v30 = vld [vmem:[#allocation5 + $0x8] sm:$0xff]  ;;  %v62_v31 = vld [vmem:[#allocation5 + $0x80] sm:$0xff] }
  0x26   :  { %207 = vmatprep.subr.mxu0 %v72_v10  ;;  %v46_v32 = vld [vmem:[#allocation5] sm:$0xff]  ;;  %v44_v33 = vld [vmem:[#allocation2] sm:$0xff] }
  0x27   :  { %208 = vmatpush3.msra.mxu0 %v56_v11  ;;  %v196_v35 = vld [vmem:[%s378_s2] ss:$0 sm:$0xff] }
  0x28   :  { %209 = vmatprep.subr.mxu0 %v71_v12 }
  0x29   :  { %210 = vmatpush3.msra.mxu0 %v55_v14 }
  0x2a   :  { %211 = vmatprep.subr.mxu0 %v70_v15 }
  0x2b   :  { %212 = vmatpush3.msra.mxu0 %v54_v16 }
  0x2c   :  { %213 = vmatprep.subr.mxu0 %v69_v17 }
  0x2d   :  { %214 = vmatpush3.msra.mxu0 %v53_v18 }
  0x2e   :  { %215 = vmatprep.subr.mxu0 %v68_v19 }
  0x2f   :  { %216 = vmatpush3.msra.mxu0 %v52_v20 }
  0x30   :  { %217 = vmatprep.subr.mxu0 %v67_v21 }
  0x31   :  { %218 = vmatpush3.msra.mxu0 %v51_v22 }
  0x32   :  { %219 = vmatprep.subr.mxu0 %v66_v23 }
  0x33   :  { %220 = vmatpush3.msra.mxu0 %v50_v24 }
  0x34   :  { %221 = vmatprep.subr.mxu0 %v65_v25 }
  0x35   :  { %222 = vmatpush3.msra.mxu0 %v49_v26 }
  0x36   :  { %223 = vmatprep.subr.mxu0 %v64_v27 }
  0x37   :  { %224 = vmatpush3.msra.mxu0 %v48_v28 }
  0x38   :  { %225 = vmatprep.subr.mxu0 %v63_v29 }
  0x39   :  { %226 = vmatpush3.msra.mxu0 %v47_v30 }
  0x3a   :  { %227 = vmatprep.subr.mxu0 %v62_v31 }
  0x3b   :  { %228 = vmatpush3.msra.mxu0 %v46_v32 }
  0x3c   :  { %150 = vmatmul.mubr.f32.vlgmr.msra.gmra.mxu0 %v44_v33 }
  0xfc   :  { %v229_v34 = vpop.f32.mrf.mxu0 }
  0xfe   :  { %v230_v36 = vpop.f32.mrf.mxu0 }
  0xff   :  { %v231_v37 = vadd.f32 %v230_v36, %v229_v34 }
 0x101   :  { %v152_v38 = vadd.f32 %v231_v37, %v196_v35 }
 0x103   :  { %155 = vst [vmem:[#allocation7] sm:$0xff] %v152_v38  ;;  %156 = vmax.xlane.f32.xlu0 %v152_v38 }
 0x18c   :  { %v157_v39 = vpop.xlane.xlu0 %156 }
 0x18d   :  { %v158_v40 = vsub.f32 %v152_v38, %v157_v39 }
 0x18f   :  { %v159_v41 = vmul.f32 1.442695, %v158_v40 }
 0x191   :  { %238 = vpow2.f32 %v159_v41 }
 0x19e   :  { %v239_v42 = vpop.eup %238 }
 0x19f   :  { %161 = vadd.xlane.f32.xlu0 %v239_v42 }
 0x1a0   :  { %293 = shalt.err (!%p290_p0)
}
 0x1a1   :  { %175 = dma.vmem_to_hbm [thread:$0]  %s173_s28, 128, %s379_s3, [#allocation4]  }
 0x1a2   :  { %s335_s5 = smov [#allocation8]  }
 0x1a3   :  { %s182_s6 = sshll.u32 %s335_s5, 4  ;;  %s183_s6 = int_to_ptr.vmem [resolvable:$true] %s182_s6 }
 0x1a4   :  { %s302_s7 = scalar_lea.vmem %s183_s6, 128  ;;  %p307_p2 = scmp.lt.s32.totalorder %s183_s6, %s183_s6 }
 0x1a5   :  { %p303_p1 = scmp.ne.s32.totalorder %s183_s6, %s302_s7  ;;  %p308_p3 = scmp.lt.s32.totalorder %s302_s7, %s302_s7 }
 0x1a7   :  { %p309_p4 = por %p308_p3, %p307_p2 }
 0x1a9   :  { %p310_p5 = pnand %p309_p4, %p303_p1 }
 0x228   :  { %v162_v43 = vpop.xlane.xlu0 %161 }
 0x229   :  { %240 = vrcp.f32 %v162_v43 }
 0x236   :  { %v241_v44 = vpop.eup %240 }
 0x237   :  { %v164_v45 = vmul.f32 %v241_v44, %v239_v42 }
 0x239   :  { %165 = vst [vmem:[#allocation8] sm:$0xff] %v164_v45 }
 0x23a   :  { %313 = shalt.err (!%p310_p5)
}
 0x23b   :  { %185 = dma.vmem_to_hbm [thread:$0]  %s183_s6, 128, %s380_s4, [#allocation9]  }
 0x23c   :  { %326 = dma.done.wait [#allocation4], 128  }
 0x23d   :  { %327 = vsyncadd [#allocation4], 4294967168 }
 0x23e   :  { %328 = dma.done.wait [#allocation9], 128  }
 0x23f   :  { %329 = vsyncadd [#allocation9], 4294967168 }
 0x240   :  { %192 = vsyncpa [#allocation3], 1 }
 0x241   :  { %193 = vsyncpa [#allocation6], 1 }
 0x242   :  { %194 = vsyncpa [#allocation4], 1 }
 0x243   :  { %195 = vsyncpa [#allocation9], 1 }

</bundles_post_ra>
